<compile_context>
chip_gen: v7x
topology: tpu7x:2x2x1
jax: 0.10.0
libtpu: 0.0.40
codegen_flags: <defaults>
</compile_context>

<pallas_src>
import jax
import jax.numpy as jnp
from jax import lax
from jax.experimental import pallas as pl
from jax.experimental.pallas import tpu as pltpu


def _attention_flash_kernel(xq_ref, xkv_ref, wq_ref, bq_ref, wkv_ref, bkv_ref,
                            gamma_ref, o_ref, qt_ref, m_ref, l_ref, acc_ref):
    """One (batch, q-tile, kv-tile) grid step.

    Layouts (channels-major, i.e. NCHW flattened to (C, N)):
      xq_ref  : (1, C, TQ)    query-position source rows (also the residual)
      xkv_ref : (1, C, TK)    key/value-position source rows
      wq_ref  : (C8p, C)      padded Wq (rows >= C8 are zero)
      bq_ref  : (C8p, 1)      padded bq (f32)
      wkv_ref : (C8p + C, C)  fused [Wk (padded) ; Wv]
      bkv_ref : (C8p + C, 1)  fused bias (f32)
      gamma   : (1,) SMEM scalar
      o_ref   : (1, C, TQ)    output tile (lane-dense in TQ)
      qt_ref  : (TQ, C8p)     scratch: q^T for the current query tile
      m_ref/l_ref : (TQ, 1)   scratch: online-softmax running max / sum (f32)
      acc_ref : (TQ, C)       scratch: unnormalized output accumulator (f32)
    """
    ki = pl.program_id(2)
    nk = pl.num_programs(2)
    C8p = wq_ref.shape[0]
    cdt = qt_ref.dtype                      # MXU compute dtype

    @pl.when(ki == 0)
    def _init():
        # Project q once per query tile: (C8p, C) @ (C, TQ) -> (C8p, TQ).
        xq = xq_ref[0].astype(cdt)
        q_cn = jnp.dot(wq_ref[...], xq,
                       preferred_element_type=jnp.float32) + bq_ref[...]
        qt_ref[...] = jnp.transpose(q_cn).astype(cdt)          # (TQ, C8p)
        m_ref[...] = jnp.full(m_ref.shape, -jnp.inf, jnp.float32)
        l_ref[...] = jnp.zeros(l_ref.shape, jnp.float32)
        acc_ref[...] = jnp.zeros(acc_ref.shape, jnp.float32)

    # Fused K/V projection for this KV tile: one MXU matmul, f32 accumulation.
    # TODO(synk): K/V are re-projected once per query tile; for very large N a
    # separate projection pass (qkv cached in HBM) would remove that recompute.
    xkv = xkv_ref[0].astype(cdt)                                # (C, TK)
    kv = jnp.dot(wkv_ref[...], xkv,
                 preferred_element_type=jnp.float32) + bkv_ref[...]
    k = kv[:C8p].astype(cdt)                                    # (C8p, TK) aligned slice
    v = kv[C8p:].astype(cdt)                                    # (C,   TK) aligned slice

    # Scores for this (q-tile, kv-tile) pair; softmax over keys (lane dim),
    # accumulated online (flash) so no O(N^2) buffer is materialized.
    s = jnp.dot(qt_ref[...], k, preferred_element_type=jnp.float32)   # (TQ, TK)
    m_prev = m_ref[...]
    m_new = jnp.maximum(m_prev, jnp.max(s, axis=-1, keepdims=True))
    alpha = jnp.exp(m_prev - m_new)
    p = jnp.exp(s - m_new)
    l_ref[...] = alpha * l_ref[...] + jnp.sum(p, axis=-1, keepdims=True)
    # PV: contract over the key axis of p (TQ, TK) and v (C, TK) -> (TQ, C).
    pv = lax.dot_general(p.astype(cdt), v, (((1,), (1,)), ((), ())),
                         preferred_element_type=jnp.float32)
    acc_ref[...] = alpha * acc_ref[...] + pv
    m_ref[...] = m_new

    @pl.when(ki == nk - 1)
    def _finalize():
        # Post-PV softmax normalization: exact reciprocal over only TQ values,
        # then one small transpose back to the channels-major output layout.
        inv_l = 1.0 / l_ref[...]
        out_cq = jnp.transpose(acc_ref[...] * inv_l)            # (C, TQ)
        o_ref[0] = (gamma_ref[0] * out_cq
                    + xq_ref[0].astype(jnp.float32)).astype(o_ref.dtype)


def _pick_tile(n, target):
    """Largest multiple of 128 that divides n and is <= target, else n."""
    if n <= target:
        return n
    best = None
    t = 128
    while t <= target:
        if n % t == 0:
            best = t
        t += 128
    return best if best is not None else n


def _round_up(x, m):
    return -(-x // m) * m


def attention_block(x_nchw, wq, bq, wk, bk, wv, bv, gamma, *,
                    q_tile=512, kv_tile=512, mxu_dtype=None):
    """SAGAN attention-block forward.

    x_nchw: (B, C, H, W); wq/wk: (C//8, C); wv: (C, C); biases matching;
    gamma: scalar.  mxu_dtype: optional dtype for the MXU operands (e.g.
    jnp.bfloat16 for f32 inputs); accumulation is always f32.
    """
    B, C, H, W = x_nchw.shape
    C8 = wq.shape[0]
    N = H * W
    in_dtype = x_nchw.dtype
    assert C % 8 == 0, "channel count must be a multiple of 8 (sublane tiling)"
    cdt = jnp.dtype(mxu_dtype) if mxu_dtype is not None else jnp.dtype(in_dtype)

    TQ = _pick_tile(N, q_tile)
    TK = _pick_tile(N, kv_tile)
    C8p = max(8, _round_up(C8, 8))          # sublane-aligned q/k segment rows

    # NCHW -> (B, C, N): pure reshape, no HBM relayout; the kernel consumes and
    # produces this channels-major layout directly (output transpose fused).
    x_cn = x_nchw.reshape(B, C, N)

    # Padded / fused projection weights in the MXU compute dtype; biases f32
    # (added to the f32 accumulator). Padded rows are zero -> no score change.
    wq_pad = jnp.zeros((C8p, C), cdt).at[:C8].set(wq.astype(cdt))
    bq_pad = jnp.zeros((C8p, 1), jnp.float32).at[:C8, 0].set(bq.astype(jnp.float32))
    wkv_pad = (jnp.zeros((C8p + C, C), cdt)
               .at[:C8].set(wk.astype(cdt))
               .at[C8p:].set(wv.astype(cdt)))
    bkv_pad = (jnp.zeros((C8p + C, 1), jnp.float32)
               .at[:C8, 0].set(bk.astype(jnp.float32))
               .at[C8p:, 0].set(bv.astype(jnp.float32)))
    gamma1 = jnp.asarray(gamma, jnp.float32).reshape(1)

    grid = (B, N // TQ, N // TK)

    # VMEM budget: double-buffered x/out tiles, resident weights, scratch, and
    # the per-step f32 intermediates; clamp to physical VMEM minus headroom.
    it_in = jnp.dtype(in_dtype).itemsize
    it_c = jnp.dtype(cdt).itemsize
    need = (2 * C * TQ * it_in + 2 * C * TK * it_in + 2 * C * TQ * it_in
            + (C8p * C + (C8p + C) * C) * it_c + (2 * C8p + C) * 4
            + TQ * C8p * it_c + 2 * TQ * 4 + TQ * C * 4
            + 4 * TQ * TK * 4 + 2 * (C8p + C) * TK * 4)
    need = int(need * 1.5) + (4 << 20)
    try:
        phys = int(getattr(pltpu.get_tpu_info(), "vmem_capacity_bytes", 64 << 20))
    except Exception:
        phys = 64 << 20
    vmem_limit = int(min(max(need, 32 << 20), max(phys - (8 << 20), 32 << 20)))

    out_cn = pl.pallas_call(
        _attention_flash_kernel,
        out_shape=jax.ShapeDtypeStruct((B, C, N), in_dtype),
        grid_spec=pltpu.PrefetchScalarGridSpec(
            num_scalar_prefetch=0,
            grid=grid,
            in_specs=[
                pl.BlockSpec((1, C, TQ), lambda b, qi, ki: (b, 0, qi)),  # x (q rows)
                pl.BlockSpec((1, C, TK), lambda b, qi, ki: (b, 0, ki)),  # x (kv rows)
                pl.BlockSpec((C8p, C), lambda b, qi, ki: (0, 0)),        # Wq (padded)
                pl.BlockSpec((C8p, 1), lambda b, qi, ki: (0, 0)),        # bq (padded)
                pl.BlockSpec((C8p + C, C), lambda b, qi, ki: (0, 0)),    # [Wk ; Wv]
                pl.BlockSpec((C8p + C, 1), lambda b, qi, ki: (0, 0)),    # [bk ; bv]
                pl.BlockSpec(memory_space=pltpu.MemorySpace.SMEM),       # gamma
            ],
            out_specs=pl.BlockSpec((1, C, TQ), lambda b, qi, ki: (b, 0, qi)),
            scratch_shapes=[
                pltpu.VMEM((TQ, C8p), cdt),         # q^T for current query tile
                pltpu.VMEM((TQ, 1), jnp.float32),   # m (running max)
                pltpu.VMEM((TQ, 1), jnp.float32),   # l (running sum)
                pltpu.VMEM((TQ, C), jnp.float32),   # output accumulator
            ],
        ),
        compiler_params=pltpu.CompilerParams(
            dimension_semantics=("parallel", "parallel", "arbitrary"),
            vmem_limit_bytes=vmem_limit),
    )(x_cn, x_cn, wq_pad, bq_pad, wkv_pad, bkv_pad, gamma1)

    return out_cn.reshape(B, C, H, W)


def reference(x_nchw, wq, bq, wk, bk, wv, bv, gamma):
    """Pure-JAX reference mirroring the PyTorch forward (NCHW)."""
    B, C, H, W = x_nchw.shape
    N = H * W
    xf = x_nchw.reshape(B, C, N)                                   # (B, C, N)
    q = jnp.einsum('oc,bcn->bon', wq, xf) + bq[None, :, None]      # (B, C8, N)
    k = jnp.einsum('oc,bcn->bon', wk, xf) + bk[None, :, None]
    v = jnp.einsum('oc,bcn->bon', wv, xf) + bv[None, :, None]      # (B, C, N)
    attn = jnp.einsum('bci,bcj->bij', q, k)                        # (B, N, N)
    attn = jax.nn.softmax(attn, axis=2)
    out = jnp.einsum('bcj,bij->bci', v, attn)                      # (B, C, N)
    return (gamma * out + xf).reshape(B, C, H, W)


if __name__ == "__main__":
    B, C, H, W = 2, 32, 8, 8          # C // 8 == 4
    C8 = C // 8

    key = jax.random.PRNGKey(0)
    kx, kq, kk, kwv, kbq, kbk, kbv = jax.random.split(key, 7)

    x = jax.random.normal(kx, (B, C, H, W), jnp.float32)
    wq = 0.1 * jax.random.normal(kq, (C8, C), jnp.float32)
    wk = 0.1 * jax.random.normal(kk, (C8, C), jnp.float32)
    wv = 0.1 * jax.random.normal(kwv, (C, C), jnp.float32)
    bq = 0.01 * jax.random.normal(kbq, (C8,), jnp.float32)
    bk = 0.01 * jax.random.normal(kbk, (C8,), jnp.float32)
    bv = 0.01 * jax.random.normal(kbv, (C,), jnp.float32)
    # PyTorch inits gamma to 0 (output would trivially equal x); use a nonzero
    # value so the attention path is exercised numerically.
    gamma = jnp.float32(0.5)

    y_ref = reference(x, wq, bq, wk, bk, wv, bv, gamma)

    # 1) f32 end-to-end (f32 MXU operands, exact softmax normalization).
    y = jax.block_until_ready(attention_block(x, wq, bq, wk, bk, wv, bv, gamma))
    assert y.shape == (B, C, H, W)
    assert jnp.allclose(y, y_ref, atol=5e-3, rtol=5e-3), "f32 mismatch vs reference"

    # 2) bf16 inputs (bf16 MXU operands, f32 accumulation) — loose tolerance.
    xb = x.astype(jnp.bfloat16)
    yb = jax.block_until_ready(attention_block(xb, wq, bq, wk, bk, wv, bv, gamma))
    yb_ref = reference(xb.astype(jnp.float32), wq, bq, wk, bk, wv, bv, gamma)
    assert yb.dtype == jnp.bfloat16
    assert jnp.allclose(yb.astype(jnp.float32), yb_ref, atol=6e-2, rtol=6e-2), \
        "bf16 mismatch vs reference"

    # 3) f32 inputs with bf16 MXU operands (review: MXU is bf16-native).
    ym = jax.block_until_ready(
        attention_block(x, wq, bq, wk, bk, wv, bv, gamma, mxu_dtype=jnp.bfloat16))
    assert ym.dtype == jnp.float32
    assert jnp.allclose(ym, y_ref, atol=6e-2, rtol=6e-2), \
        "mixed-precision mismatch vs reference"

    print("KERNEL_OK")
</pallas_src>

<mosaic_0001>
module attributes {stable_mosaic.version = 11 : i64} {
  func.func @_attention_flash_kernel(%arg0: i32, %arg1: i32, %arg2: i32, %arg3: memref<1x32x64xf32, #tpu.memory_space<vmem>>, %arg4: memref<1x32x64xf32, #tpu.memory_space<vmem>>, %arg5: memref<8x32xf32, #tpu.memory_space<vmem>>, %arg6: memref<8x1xf32, #tpu.memory_space<vmem>>, %arg7: memref<40x32xf32, #tpu.memory_space<vmem>>, %arg8: memref<40x1xf32, #tpu.memory_space<vmem>>, %arg9: memref<1xf32, #tpu.memory_space<smem>>, %arg10: memref<1x32x64xf32, #tpu.memory_space<vmem>>, %arg11: memref<64x8xf32, #tpu.memory_space<vmem>>, %arg12: memref<64x1xf32, #tpu.memory_space<vmem>>, %arg13: memref<64x1xf32, #tpu.memory_space<vmem>>, %arg14: memref<64x32xf32, #tpu.memory_space<vmem>>) attributes {dimension_semantics = [#tpu.dimension_semantics<parallel>, #tpu.dimension_semantics<parallel>, #tpu.dimension_semantics<arbitrary>], iteration_bounds = array<i64: 2, 1, 1>, scalar_prefetch = 0 : i64, scratch_operands = 4 : i64, tpu.core_type = #tpu.core_type<tc>, window_params = [{transform_indices = @transform_0, window_bounds = array<i64: 1, 32, 64>}, {transform_indices = @transform_1, window_bounds = array<i64: 1, 32, 64>}, {pipeline_mode = #tpu.pipeline_mode<synchronous>, transform_indices = @transform_2, window_bounds = array<i64: 8, 32>}, {pipeline_mode = #tpu.pipeline_mode<synchronous>, transform_indices = @transform_3, window_bounds = array<i64: 8, 1>}, {pipeline_mode = #tpu.pipeline_mode<synchronous>, transform_indices = @transform_4, window_bounds = array<i64: 40, 32>}, {pipeline_mode = #tpu.pipeline_mode<synchronous>, transform_indices = @transform_5, window_bounds = array<i64: 40, 1>}, {transform_indices = @transform_6, window_bounds = array<i64: 1>}, {transform_indices = @transform_7, window_bounds = array<i64: 1, 32, 64>}]} {
    %c0_i32 = arith.constant 0 : i32
    %0 = arith.cmpi eq, %arg2, %c0_i32 : i32
    %1 = arith.extui %0 : i1 to i32
    %c0_i32_0 = arith.constant 0 : i32
    %2 = arith.cmpi ne, %1, %c0_i32_0 : i32
    scf.if %2 {
      %c0_27 = arith.constant 0 : index
      %c0_28 = arith.constant 0 : index
      %c0_29 = arith.constant 0 : index
      %39 = vector.load %arg3[%c0_27, %c0_28, %c0_29] : memref<1x32x64xf32, #tpu.memory_space<vmem>>, vector<1x32x64xf32>
      %40 = vector.shape_cast %39 : vector<1x32x64xf32> to vector<32x64xf32>
      %c0_30 = arith.constant 0 : index
      %c0_31 = arith.constant 0 : index
      %41 = vector.load %arg5[%c0_30, %c0_31] : memref<8x32xf32, #tpu.memory_space<vmem>>, vector<8x32xf32>
      %cst_32 = arith.constant dense<0.000000e+00> : vector<8x64xf32>
      %42 = tpu.matmul %41, %40, %cst_32 {dimension_numbers = #tpu.dot_dimension_numbers<[1], [0], [0], [1], [0, 0, 1, 1], [], []>} : vector<8x32xf32>, vector<32x64xf32>, vector<8x64xf32> -> vector<8x64xf32>
      %c0_33 = arith.constant 0 : index
      %c0_34 = arith.constant 0 : index
      %43 = vector.load %arg6[%c0_33, %c0_34] : memref<8x1xf32, #tpu.memory_space<vmem>>, vector<8x1xf32>
      %44 = vector.broadcast %43 : vector<8x1xf32> to vector<8x64xf32>
      %45 = arith.addf %42, %44 : vector<8x64xf32>
      %46 = tpu.transpose %45, [1, 0] : vector<8x64xf32> -> vector<64x8xf32>
      %c0_35 = arith.constant 0 : index
      %c0_36 = arith.constant 0 : index
      %47 = vector.load %arg11[%c0_35, %c0_36] : memref<64x8xf32, #tpu.memory_space<vmem>>, vector<64x8xf32>
      tpu.vector_store %arg11[%c0_35, %c0_36], %46 {strides = array<i32>} : memref<64x8xf32, #tpu.memory_space<vmem>>, vector<64x8xf32>,
      %cst_37 = arith.constant 0xFF800000 : f32
      %48 = vector.broadcast %cst_37 : f32 to vector<64x1xf32>
      %c0_38 = arith.constant 0 : index
      %c0_39 = arith.constant 0 : index
      %49 = vector.load %arg12[%c0_38, %c0_39] : memref<64x1xf32, #tpu.memory_space<vmem>>, vector<64x1xf32>
      tpu.vector_store %arg12[%c0_38, %c0_39], %48 {strides = array<i32>} : memref<64x1xf32, #tpu.memory_space<vmem>>, vector<64x1xf32>,
      %cst_40 = arith.constant 0.000000e+00 : f32
      %50 = vector.broadcast %cst_40 : f32 to vector<64x1xf32>
      %c0_41 = arith.constant 0 : index
      %c0_42 = arith.constant 0 : index
      %51 = vector.load %arg13[%c0_41, %c0_42] : memref<64x1xf32, #tpu.memory_space<vmem>>, vector<64x1xf32>
      tpu.vector_store %arg13[%c0_41, %c0_42], %50 {strides = array<i32>} : memref<64x1xf32, #tpu.memory_space<vmem>>, vector<64x1xf32>,
      %cst_43 = arith.constant 0.000000e+00 : f32
      %52 = vector.broadcast %cst_43 : f32 to vector<64x32xf32>
      %c0_44 = arith.constant 0 : index
      %c0_45 = arith.constant 0 : index
      %53 = vector.load %arg14[%c0_44, %c0_45] : memref<64x32xf32, #tpu.memory_space<vmem>>, vector<64x32xf32>
      tpu.vector_store %arg14[%c0_44, %c0_45], %52 {strides = array<i32>} : memref<64x32xf32, #tpu.memory_space<vmem>>, vector<64x32xf32>,
    } else {
    }
    %c0 = arith.constant 0 : index
    %c0_1 = arith.constant 0 : index
    %c0_2 = arith.constant 0 : index
    %3 = vector.load %arg4[%c0, %c0_1, %c0_2] : memref<1x32x64xf32, #tpu.memory_space<vmem>>, vector<1x32x64xf32>
    %4 = vector.shape_cast %3 : vector<1x32x64xf32> to vector<32x64xf32>
    %c0_3 = arith.constant 0 : index
    %c0_4 = arith.constant 0 : index
    %5 = vector.load %arg7[%c0_3, %c0_4] : memref<40x32xf32, #tpu.memory_space<vmem>>, vector<40x32xf32>
    %cst = arith.constant dense<0.000000e+00> : vector<40x64xf32>
    %6 = tpu.matmul %5, %4, %cst {dimension_numbers = #tpu.dot_dimension_numbers<[1], [0], [0], [1], [0, 0, 1, 1], [], []>} : vector<40x32xf32>, vector<32x64xf32>, vector<40x64xf32> -> vector<40x64xf32>
    %c0_5 = arith.constant 0 : index
    %c0_6 = arith.constant 0 : index
    %7 = vector.load %arg8[%c0_5, %c0_6] : memref<40x1xf32, #tpu.memory_space<vmem>>, vector<40x1xf32>
    %8 = vector.broadcast %7 : vector<40x1xf32> to vector<40x64xf32>
    %9 = arith.addf %6, %8 : vector<40x64xf32>
    %10 = vector.extract_strided_slice %9 {offsets = [0, 0], sizes = [8, 64], strides = [1, 1]} : vector<40x64xf32> to vector<8x64xf32>
    %11 = vector.extract_strided_slice %9 {offsets = [8, 0], sizes = [32, 64], strides = [1, 1]} : vector<40x64xf32> to vector<32x64xf32>
    %c0_7 = arith.constant 0 : index
    %c0_8 = arith.constant 0 : index
    %12 = vector.load %arg11[%c0_7, %c0_8] : memref<64x8xf32, #tpu.memory_space<vmem>>, vector<64x8xf32>
    %cst_9 = arith.constant dense<0.000000e+00> : vector<64x64xf32>
    %13 = tpu.matmul %12, %10, %cst_9 {dimension_numbers = #tpu.dot_dimension_numbers<[1], [0], [0], [1], [0, 0, 1, 1], [], []>} : vector<64x8xf32>, vector<8x64xf32>, vector<64x64xf32> -> vector<64x64xf32>
    %c0_10 = arith.constant 0 : index
    %c0_11 = arith.constant 0 : index
    %14 = vector.load %arg12[%c0_10, %c0_11] : memref<64x1xf32, #tpu.memory_space<vmem>>, vector<64x1xf32>
    %cst_12 = arith.constant dense<0xFF800000> : vector<64xf32>
    %15 = vector.multi_reduction <maximumf>, %13, %cst_12 [1] : vector<64x64xf32> to vector<64xf32>
    %16 = vector.shape_cast %15 : vector<64xf32> to vector<64x1xf32>
    %17 = arith.maximumf %14, %16 : vector<64x1xf32>
    %18 = arith.subf %14, %17 : vector<64x1xf32>
    %19 = math.exp %18 : vector<64x1xf32>
    %20 = vector.broadcast %17 : vector<64x1xf32> to vector<64x64xf32>
    %21 = arith.subf %13, %20 : vector<64x64xf32>
    %22 = math.exp %21 : vector<64x64xf32>
    %c0_13 = arith.constant 0 : index
    %c0_14 = arith.constant 0 : index
    %23 = vector.load %arg13[%c0_13, %c0_14] : memref<64x1xf32, #tpu.memory_space<vmem>>, vector<64x1xf32>
    %24 = arith.mulf %19, %23 : vector<64x1xf32>
    %cst_15 = arith.constant dense<0.000000e+00> : vector<64xf32>
    %25 = vector.multi_reduction <add>, %22, %cst_15 [1] : vector<64x64xf32> to vector<64xf32>
    %26 = vector.shape_cast %25 : vector<64xf32> to vector<64x1xf32>
    %27 = arith.addf %24, %26 : vector<64x1xf32>
    %c0_16 = arith.constant 0 : index
    %c0_17 = arith.constant 0 : index
    %28 = vector.load %arg13[%c0_16, %c0_17] : memref<64x1xf32, #tpu.memory_space<vmem>>, vector<64x1xf32>
    tpu.vector_store %arg13[%c0_16, %c0_17], %27 {strides = array<i32>} : memref<64x1xf32, #tpu.memory_space<vmem>>, vector<64x1xf32>,
    %cst_18 = arith.constant dense<0.000000e+00> : vector<64x32xf32>
    %29 = tpu.matmul %22, %11, %cst_18 {dimension_numbers = #tpu.dot_dimension_numbers<[1], [1], [0], [0], [0, 0, 1, 0], [], []>} : vector<64x64xf32>, vector<32x64xf32>, vector<64x32xf32> -> vector<64x32xf32>
    %c0_19 = arith.constant 0 : index
    %c0_20 = arith.constant 0 : index
    %30 = vector.load %arg14[%c0_19, %c0_20] : memref<64x32xf32, #tpu.memory_space<vmem>>, vector<64x32xf32>
    %31 = vector.broadcast %19 : vector<64x1xf32> to vector<64x32xf32>
    %32 = arith.mulf %31, %30 : vector<64x32xf32>
    %33 = arith.addf %32, %29 : vector<64x32xf32>
    %c0_21 = arith.constant 0 : index
    %c0_22 = arith.constant 0 : index
    %34 = vector.load %arg14[%c0_21, %c0_22] : memref<64x32xf32, #tpu.memory_space<vmem>>, vector<64x32xf32>
    tpu.vector_store %arg14[%c0_21, %c0_22], %33 {strides = array<i32>} : memref<64x32xf32, #tpu.memory_space<vmem>>, vector<64x32xf32>,
    %c0_23 = arith.constant 0 : index
    %c0_24 = arith.constant 0 : index
    %35 = vector.load %arg12[%c0_23, %c0_24] : memref<64x1xf32, #tpu.memory_space<vmem>>, vector<64x1xf32>
    tpu.vector_store %arg12[%c0_23, %c0_24], %17 {strides = array<i32>} : memref<64x1xf32, #tpu.memory_space<vmem>>, vector<64x1xf32>,
    %c0_i32_25 = arith.constant 0 : i32
    %36 = arith.cmpi eq, %arg2, %c0_i32_25 : i32
    %37 = arith.extui %36 : i1 to i32
    %c0_i32_26 = arith.constant 0 : i32
    %38 = arith.cmpi ne, %37, %c0_i32_26 : i32
    scf.if %38 {
      %c0_27 = arith.constant 0 : index
      %c0_28 = arith.constant 0 : index
      %39 = vector.load %arg13[%c0_27, %c0_28] : memref<64x1xf32, #tpu.memory_space<vmem>>, vector<64x1xf32>
      %cst_29 = arith.constant 1.000000e+00 : f32
      %40 = vector.broadcast %cst_29 : f32 to vector<64x1xf32>
      %41 = arith.divf %40, %39 : vector<64x1xf32>
      %c0_30 = arith.constant 0 : index
      %c0_31 = arith.constant 0 : index
      %42 = vector.load %arg14[%c0_30, %c0_31] : memref<64x32xf32, #tpu.memory_space<vmem>>, vector<64x32xf32>
      %43 = vector.broadcast %41 : vector<64x1xf32> to vector<64x32xf32>
      %44 = arith.mulf %42, %43 : vector<64x32xf32>
      %45 = tpu.transpose %44, [1, 0] : vector<64x32xf32> -> vector<32x64xf32>
      %c0_32 = arith.constant 0 : index
      %46 = memref.load %arg9[%c0_32] : memref<1xf32, #tpu.memory_space<smem>>
      %47 = vector.broadcast %46 : f32 to vector<32x64xf32>
      %48 = arith.mulf %47, %45 : vector<32x64xf32>
      %c0_33 = arith.constant 0 : index
      %c0_34 = arith.constant 0 : index
      %c0_35 = arith.constant 0 : index
      %49 = vector.load %arg3[%c0_33, %c0_34, %c0_35] : memref<1x32x64xf32, #tpu.memory_space<vmem>>, vector<1x32x64xf32>
      %50 = vector.shape_cast %49 : vector<1x32x64xf32> to vector<32x64xf32>
      %51 = arith.addf %48, %50 : vector<32x64xf32>
      %c0_36 = arith.constant 0 : index
      %c0_37 = arith.constant 0 : index
      %c0_38 = arith.constant 0 : index
      %52 = vector.load %arg10[%c0_36, %c0_37, %c0_38] : memref<1x32x64xf32, #tpu.memory_space<vmem>>, vector<1x32x64xf32>
      %53 = vector.shape_cast %52 : vector<1x32x64xf32> to vector<32x64xf32>
      %54 = vector.shape_cast %51 : vector<32x64xf32> to vector<1x32x64xf32>
      tpu.vector_store %arg10[%c0_36, %c0_37, %c0_38], %54 {strides = array<i32>} : memref<1x32x64xf32, #tpu.memory_space<vmem>>, vector<1x32x64xf32>,
    } else {
    }
    return
  }
  func.func @transform_0(%arg0: i32, %arg1: i32, %arg2: i32) -> (i32, i32, i32) {
    %c0_i32 = arith.constant 0 : i32
    %c0_i32_0 = arith.constant 0 : i32
    return %arg0, %c0_i32, %arg1 : i32, i32, i32
  }
  func.func @transform_1(%arg0: i32, %arg1: i32, %arg2: i32) -> (i32, i32, i32) {
    %c0_i32 = arith.constant 0 : i32
    %c0_i32_0 = arith.constant 0 : i32
    return %arg0, %c0_i32, %arg2 : i32, i32, i32
  }
  func.func @transform_2(%arg0: i32, %arg1: i32, %arg2: i32) -> (i32, i32) {
    %c0_i32 = arith.constant 0 : i32
    %c0_i32_0 = arith.constant 0 : i32
    %c0_i32_1 = arith.constant 0 : i32
    return %c0_i32, %c0_i32_0 : i32, i32
  }
  func.func @transform_3(%arg0: i32, %arg1: i32, %arg2: i32) -> (i32, i32) {
    %c0_i32 = arith.constant 0 : i32
    %c0_i32_0 = arith.constant 0 : i32
    %c0_i32_1 = arith.constant 0 : i32
    return %c0_i32, %c0_i32_0 : i32, i32
  }
  func.func @transform_4(%arg0: i32, %arg1: i32, %arg2: i32) -> (i32, i32) {
    %c0_i32 = arith.constant 0 : i32
    %c0_i32_0 = arith.constant 0 : i32
    %c0_i32_1 = arith.constant 0 : i32
    return %c0_i32, %c0_i32_0 : i32, i32
  }
  func.func @transform_5(%arg0: i32, %arg1: i32, %arg2: i32) -> (i32, i32) {
    %c0_i32 = arith.constant 0 : i32
    %c0_i32_0 = arith.constant 0 : i32
    %c0_i32_1 = arith.constant 0 : i32
    return %c0_i32, %c0_i32_0 : i32, i32
  }
  func.func @transform_6(%arg0: i32, %arg1: i32, %arg2: i32) -> i32 {
    %c0_i32 = arith.constant 0 : i32
    %c0_i32_0 = arith.constant 0 : i32
    return %c0_i32 : i32
  }
  func.func @transform_7(%arg0: i32, %arg1: i32, %arg2: i32) -> (i32, i32, i32) {
    %c0_i32 = arith.constant 0 : i32
    %c0_i32_0 = arith.constant 0 : i32
    return %arg0, %c0_i32, %arg1 : i32, i32, i32
  }
}

</mosaic_0001>

<bundles_post_ra>
// kernel: tpu_custom_call.1
= control target key start
LH: loop header
LB: loop body
LE: loop exit
PB: predicated region body
PF: predicated region fallthrough
CT: control target
= control target key end

     0   :  { %s2382_s0 = inlined_call_operand.vmem [shape: f32[2,32,64], index: 0, kind: input, shape index: {}]   ;;  %s2383_s1 = inlined_call_operand.vmem [shape: f32[2,32,64], index: 1, kind: input, shape index: {}]   ;;  %s2384_s2 = inlined_call_operand.hbm [shape: f32[8,32], index: 2, kind: input, shape index: {}]   ;;  %s2385_s3 = inlined_call_operand.vmem [shape: f32[8,1], index: 3, kind: input, shape index: {}]   ;;  %s2386_s4 = inlined_call_operand.vmem [shape: f32[40,32], index: 4, kind: input, shape index: {}]   ;;  %s2387_s5 = inlined_call_operand.vmem [shape: f32[40,1], index: 5, kind: input, shape index: {}]   ;;  %s2388_s6 = inlined_call_operand.<no memory space> [shape: f32[1], index: 6, kind: input, shape index: {}]   ;;  %s2389_s7 = inlined_call_operand.hbm [shape: f32[2,32,64], index: 7, kind: output, shape index: {}]  }
   0x1   :  { %12 = sst [smem:[#allocation6]] %s2388_s6 }
   0x2   :  { %13 = vsyncpa [#allocation8], 0 }
   0x3   :  { %14 = vsyncpa [#allocation9], 0 }
   0x4   :  { %16 = vsyncpa [#allocation9 + $0x1], 0  ;;  %s1918_s26 = smov 0   ;;  %s1920_s27 = smov 0  }
   0x5   :  { %s1922_s28 = smov 0   ;;  %s1924_s29 = smov 0  }
   0x6   :  { %s1926_s30 = smov 0   ;;  %s1928_s8 = smov 0  }
   0x7 LB: > { %s1458_s6 = sadd.s32 4294967295, %s1864_s8   ;;  %s1459_s9 = sadd.s32 4294967294, %s1864_s8   ;;  %s1864_s8 = sphi %s1928_s8, %s22_s8   ;;  %s1860_s30 = sphi %s1926_s30, %s2407_s30   ;;  %s1856_s29 = sphi %s1924_s29, %s2406_s29   ;;  %s1852_s28 = sphi %s1922_s28, %s2405_s28   ;;  %s1848_s27 = sphi %s1920_s27, %s2404_s27   ;;  %s1844_s26 = sphi %s1918_s26, %s2403_s26  }
   0x8   : > { %s41_s10 = sadd.s32 1, %s1860_s30  ;;  %s211_s11 = sadd.s32 1, %s1852_s28 }
   0x9   : > { %p43_p0 = scmp.ge.s32.totalorder %s41_s10, 2  ;;  %p221_p1 = scmp.ne.s32.totalorder %s1852_s28, %s1848_s27 }
   0xa   : > { %p222_p2 = scmp.eq.s32.totalorder %s1458_s6, 1  ;;  %p227_p3 = scmp.ne.s32.totalorder %s1848_s27, %s1844_s26 }
   0xb   : > { %s2409_s10 = smov (%p43_p0, %s41_s10), 0  ;;  %p228_p5 = scmp.eq.s32.totalorder %s1459_s9, 1 }
   0xc   : > { %p1958_p4 = por %p222_p2, %p221_p1  ;;  %s206_s13 = ssub.s32 %s1860_s30, %s2409_s10 }
   0xd   : > { %p1460_p6 = scmp.ge.s32.totalorder %s1864_s8, 1  ;;  %p209_p7 = scmp.eq.s32.totalorder %s206_s13, 0 }
   0xe   : > { %s2394_s12 = scalar_select %p1958_p4, 1, 0 }
   0xf   : > { %p1965_p8 = por %p228_p5, %p227_p3  ;;  %p235_p9 = scmp.lt.s32.totalorder %s1864_s8, 3 }
  0x10   : > { %s1971_s15 = scalar_select %p209_p7, %s1852_s28, %s211_s11  }
  0x11   : > { %s2395_s14 = scalar_select %p1965_p8, 1, 0 }
  0x12   : > { %p1973_p10 = pnand %p1460_p6, %p235_p9  ;;  %p1977_p11 = scmp.eq.s32.totalorder %s1458_s6, 0 }
  0x13   : > { %s1866_s18 = smov [#allocation7]   ;;  %s1754_s23 = scalar_lea.hbm %s2384_s2, 128 }
  0x14   : > { %s2396_s16 = scalar_select %p1973_p10, 1, 0 }
  0x15   : > { %s2397_s17 = scalar_select %p1977_p11, 1, 0 }
  0x16   : > { %p1637_p12 = pneg %p1973_p10  ;;  %s248_s19 = sshll.u32 %s1866_s18, 4  ;;  %s249_s19 = int_to_ptr.vmem [resolvable:$true] %s248_s19 }
  0x17   : > { %p1755_p0 = scmp.ne.s32.totalorder %s2384_s2, %s1754_s23  ;;  %p1761_p5 = scmp.lt.u32.totalorder %s1754_s23, %s2384_s2 }
  0x18   : > { %p1985_p13 = pnand %p1977_p11, %p1637_p12 }
  0x1a   : > { %p1756_p1 = pneg %p1985_p13 }
  0x1c   : > { %p1757_p2 = pnand %p1756_p1, %p1755_p0 }
  0x1e   : > { %p1758_p3 = pneg %p1757_p2 }
  0x20   : > { %p1763_p6 = pnand %p1761_p5, %p1758_p3 }
  0x22   : > { %1766 = shalt.err (!%p1763_p6)
}
  0x23   : > { %s1767_s11 = scalar_lea.vmem %s249_s19, 128  ;;  %p1775_p8 = scmp.lt.s32.totalorder %s249_s19, %s249_s19 }
  0x24   : > { %p1768_p7 = scmp.ne.s32.totalorder %s249_s19, %s1767_s11  ;;  %p1776_p4 = scmp.lt.s32.totalorder %s1767_s11, %s1767_s11 }
  0x26   : > { %p1770_p9 = pnand %p1768_p7, %p1756_p1  ;;  %p1777_p11 = por %p1776_p4, %p1775_p8 }
  0x28   : > { %p1771_p12 = pneg %p1770_p9 }
  0x2a   : > { %p1778_p10 = pnand %p1777_p11, %p1771_p12 }
  0x2c   : > { %1781 = shalt.err (!%p1778_p10)
}
  0x2d   : > { %1640 = dma.hbm_to_vmem [thread:$0]  (!%p1985_p13), %s2384_s2, 128, %s249_s19, [#allocation8]  }
  0x2e   : > { %p2399_p0 = scmp.ne.s32.totalorder %s2396_s16, 0 }
  0x2f   : > { %p2400_p2 = scmp.ne.s32.totalorder (!%p2399_p0), %s2397_s17, 0 }
  0x30   : > { %295 = sbr.rel (%p2399_p0) target bundleno = 1385 (0x569), region = 48 }
  0x37   : > { %1835 = dma.done.wait (%p2400_p2), [#allocation8], 128  }
  0x38   : > { %1837 = vsyncadd (%p2400_p2), [#allocation8], 4294967168  ;;  %p338_p4 = scmp.lt.s32.totalorder %s1856_s29, 1  ;;  %v1867_v0 = vmov 0.0|0.0   ;;  %vm1868_vm0 = vmmov 0   ;;  %v1869_v1 = vmov 0.0  }
  0x39   : > { %1607 = vmatprep.subr.bf16.mxu1 %v1867_v0  ;;  %1547 = vmatprep.mubr.msk.f32.mxu1 %vm1868_vm0, %v1869_v1  ;;  %vm369_vm1 = vcmask 261120   ;;  %v1870_v2 = vmov 0   ;;  %v363_v9 = vld [vmem:[%s2385_s3] sm:$0xff]  ;;  %v514_v27 = vld [vmem:[%s2386_s4 + $0x8] sm:$0xff]  ;;  %v515_v28 = vld [vmem:[%s2386_s4 + $0x10] sm:$0xff]  ;;  %vm475_vm2 = vcmask 64512  }
  0x3a   : > { %s339_s19 = scalar_select %p338_p4, %s1856_s29, 1  ;;  %501 = vst.msk [vmem:[#allocation5] sm:$0xff] %vm369_vm1, %v1869_v1  ;;  %502 = vst.msk [vmem:[#allocation5 + $0x8] sm:$0xff] %vm369_vm1, %v1869_v1  ;;  %1704 = vset.pattern.permute.xlu0 %v1870_v2  ;;  %v518_v12 = vld [vmem:[%s2387_s5] sm:$0xff]  ;;  %v516_v29 = vld [vmem:[%s2386_s4 + $0x18] sm:$0xff]  ;;  %vm484_vm3 = vcmask 7168  }
  0x3b   : > { %503 = vst.msk [vmem:[#allocation5 + $0x10] sm:$0xff] %vm369_vm1, %v1869_v1  ;;  %504 = vst.msk [vmem:[#allocation5 + $0x18] sm:$0xff] %vm369_vm1, %v1869_v1  ;;  %366 = vperm.xlu0 %1704, %v363_v9   ;;  %v362_v13 = vld [vmem:[#allocation7] sm:$0xff]  ;;  %v1871_v47 = vmov -inf   ;;  %vm800_vm4 = vcmask 523264   ;;  %v520_v59 = vld [vmem:[%s2387_s5 + $0x10] sm:$0xff] }
  0x3c   : > { %505 = vst.msk [vmem:[#allocation5 + $0x20] sm:$0xff] %vm369_vm1, %v1869_v1  ;;  %506 = vst.msk [vmem:[#allocation5 + $0x28] sm:$0xff] %vm369_vm1, %v1869_v1  ;;  %s1501_s16 = sshll.u32 %s339_s19, 5  ;;  %v513_v18 = vld [vmem:[%s2386_s4] sm:$0xff]  ;;  %s1314_s17 = sld [smem:[#allocation6]] }
  0x3d   : > { %507 = vst.msk [vmem:[#allocation5 + $0x30] sm:$0xff] %vm369_vm1, %v1869_v1  ;;  %508 = vst.msk [vmem:[#allocation5 + $0x38] sm:$0xff] %vm369_vm1, %v1869_v1  ;;  %s345_s21 = scalar_lea.vmem %s2382_s0, %s1501_s16  ;;  %s353_s24 = scalar_lea.vmem %s2383_s1, %s1501_s16  ;;  %v517_v30 = vld [vmem:[%s2386_s4 + $0x20] sm:$0xff] }
  0x3e   : > { %v2034_v3 = vld [vmem:[%s345_s21] sm:$0xff]  ;;  %v2036_v4 = vld [vmem:[%s345_s21 + $0x8] sm:$0xff]  ;;  %v2038_v5 = vld [vmem:[%s345_s21 + $0x10] sm:$0xff]  ;;  %486 = vst.msk [vmem:[#allocation3 + $0x8] sm:$0xff] %vm484_vm3, %v1871_v47  ;;  %s335_s20 = sand.u32 1, %s1848_s27   ;;  %p2401_p10 = scmp.ne.s32.totalorder %s2394_s12, 0 }
  0x3f   : > { %v1608_v6 = vpack.c.bf16 %v2036_v4, %v2034_v3  ;;  %v2042_v7 = vld [vmem:[%s345_s21 + $0x18] sm:$0xff]  ;;  %v509_v10 = vld [vmem:[%s353_s24] sm:$0xff]  ;;  %v510_v11 = vld [vmem:[%s353_s24 + $0x8] sm:$0xff]  ;;  %525 = vperm.xlu0 %1704, %v518_v12   ;;  %485 = vst.msk [vmem:[#allocation3] sm:$0xff] %vm484_vm3, %v1871_v47  ;;  %s1465_s21 = sshll.u32 %s335_s20, 5  ;;  %s2336_s11 = scalar_lea.sflag [#allocation9], %s335_s20 }
  0x40   : > { %v1611_v8 = vpack.c.bf16 %v2042_v7, %v2038_v5  ;;  %v1614_v14 = vpack.c.bf16 %v510_v11, %v509_v10  ;;  %v511_v15 = vld [vmem:[%s353_s24 + $0x10] sm:$0xff]  ;;  %v512_v16 = vld [vmem:[%s353_s24 + $0x18] sm:$0xff]  ;;  %487 = vst.msk [vmem:[#allocation3 + $0x10] sm:$0xff] %vm484_vm3, %v1871_v47  ;;  %488 = vst.msk [vmem:[#allocation3 + $0x18] sm:$0xff] %vm484_vm3, %v1871_v47  ;;  %s337_s22 = scalar_lea.vmem [#allocation10], %s1465_s21  ;;  %s1503_s24 = sshll.u32 %s1856_s29, 9 }
  0x41   : > { %1609 = vmatpush3.bf16.msra.mxu1 %v1608_v6  ;;  %v1617_v17 = vpack.c.bf16 %v512_v16, %v511_v15  ;;  %489 = vst.msk [vmem:[#allocation3 + $0x20] sm:$0xff] %vm484_vm3, %v1871_v47  ;;  %490 = vst.msk [vmem:[#allocation3 + $0x28] sm:$0xff] %vm484_vm3, %v1871_v47  ;;  %v522_v61 = vld [vmem:[%s2387_s5 + $0x20] sm:$0xff]  ;;  %v521_v11 = vld [vmem:[%s2387_s5 + $0x18] sm:$0xff]  ;;  %s1347_s23 = sshll.u32 %s337_s22, 4  ;;  %s2332_s9 = scalar_lea.hbm %s2389_s7, %s1503_s24  ;;  %s2327_s23 = int_to_ptr.vmem [resolvable:$true] %s1347_s23 }
  0x42   : > { %1610 = vmatprep.subr.bf16.mxu1 %v1867_v0  ;;  %491 = vst.msk [vmem:[#allocation3 + $0x30] sm:$0xff] %vm484_vm3, %v1871_v47  ;;  %492 = vst.msk [vmem:[#allocation3 + $0x38] sm:$0xff] %vm484_vm3, %v1871_v47  ;;  %s1782_s29 = scalar_lea.vmem %s2327_s23, 512  ;;  %s1872_s13 = smov [#allocation10]  }
  0x43   : > { %493 = vst.msk [vmem:[#allocation4] sm:$0xff] %vm484_vm3, %v1869_v1  ;;  %494 = vst.msk [vmem:[#allocation4 + $0x8] sm:$0xff] %vm484_vm3, %v1869_v1  ;;  %p1783_p8 = scmp.ne.s32.totalorder %s2327_s23, %s1782_s29  ;;  %s1786_s18 = sshll.u32 %s1872_s13, 4  ;;  %s1787_s18 = int_to_ptr.vmem [resolvable:$false] %s1786_s18 }
  0x44   : > { %495 = vst.msk [vmem:[#allocation4 + $0x10] sm:$0xff] %vm484_vm3, %v1869_v1  ;;  %496 = vst.msk [vmem:[#allocation4 + $0x18] sm:$0xff] %vm484_vm3, %v1869_v1  ;;  %s1788_s19 = scalar_lea.vmem %s1787_s18, 1024  ;;  %p1789_p1 = scmp.lt.s32.totalorder %s2327_s23, %s1787_s18 }
  0x45   : > { %1612 = vmatpush3.bf16.msra.mxu1 %v1611_v8  ;;  %497 = vst.msk [vmem:[#allocation4 + $0x20] sm:$0xff] %vm484_vm3, %v1869_v1  ;;  %498 = vst.msk [vmem:[#allocation4 + $0x28] sm:$0xff] %vm484_vm3, %v1869_v1  ;;  %v2172_v16 = vld [vmem:[#allocation3 + $0x8] sm:$0xff]  ;;  %p1784_p11 = pnand %p1783_p8, %p2401_p10  ;;  %p1790_p3 = scmp.lt.s32.totalorder %s1788_s19, %s1782_s29 }
  0x46   : > { %1613 = vmatprep.subr.bf16.mxu1 %v1867_v0  ;;  %499 = vst.msk [vmem:[#allocation4 + $0x30] sm:$0xff] %vm484_vm3, %v1869_v1  ;;  %500 = vst.msk [vmem:[#allocation4 + $0x38] sm:$0xff] %vm484_vm3, %v1869_v1 }
  0x47   : > { %vm1620_vm5 = vmpackc.low %vm800_vm4, %vm800_vm4  ;;  %p1785_p13 = pneg %p1784_p11  ;;  %p1791_p5 = por %p1790_p3, %p1789_p1 }
  0x48   : > { %1548 = vmatmul.mubr.msk.f32.vlgmr.msra.gmra.mrb[0].mxu1 %vm369_vm1, %v362_v13 }
  0x49   : > { %1615 = vmatpush3.bf16.msra.mxu1 %v1614_v14  ;;  %1558 = vmatprep.mubr.msk.f32.mxu1 %vm1868_vm0, %v1869_v1  ;;  %p1792_p6 = pnand %p1791_p5, %p1785_p13 }
  0x4a   : > { %1616 = vmatprep.subr.bf16.mxu1 %v1867_v0 }
  0x4d   : > { %1618 = vmatpush3.bf16.msra.mxu1 %v1617_v17  ;;  %v2174_v17 = vld [vmem:[#allocation3] sm:$0xff] }
  0x50   : > { %1559 = vmatmul.mubr.msk.f32.vlgmr.msra.gmra.mrb[2].mxu1 %vm369_vm1, %v513_v18 }
  0x51   : > { %1561 = vmatprep.mubr.msk.f32.mxu1 %vm1868_vm0, %v1869_v1 }
  0x54   : > { %1562 = vmatmul.mubr.msk.f32.gmra.mrb[4].mxu1 %vm369_vm1, %v514_v27  ;;  %v2197_v27 = vld [vmem:[#allocation3 + $0x10] sm:$0xff] }
  0x55   : > { %1564 = vmatprep.mubr.msk.f32.mxu1 %vm1868_vm0, %v1869_v1 }
  0x58   : > { %1565 = vmatmul.mubr.msk.f32.gmra.mrb[6].mxu1 %vm369_vm1, %v515_v28 }
  0x59   : > { %1567 = vmatprep.mubr.msk.f32.mxu1 %vm1868_vm0, %v1869_v1 }
  0x5c   : > { %1568 = vmatmul.mubr.msk.f32.gmra.mrb[8].mxu1 %vm369_vm1, %v516_v29 }
  0x5d   : > { %1570 = vmatprep.mubr.msk.f32.mxu1 %vm1868_vm0, %v1869_v1 }
  0x60   : > { %1571 = vmatmul.mubr.msk.f32.gmra.mrb[10].mxu1 %vm369_vm1, %v517_v30 }
  0xba   : > { %v367_v19 = vpop.permute.xlu0 %366 }
  0xbe   : > { %v526_v23 = vpop.permute.xlu0 %525 }
 0x11b   : > { %v439_v20 = vpop.f32.mrb[0].mxu1 }
 0x11c   : > { %v1549_v21 = vpop.f32.mrb[1].mxu1  ;;  %v440_v22 = vadd.f32 %v439_v20, %v367_v19 }
 0x11e   : > { %443 = vxpose.xlu1.b32.start.end [1/1] (short) (narrow) %v440_v22, 64 }
 0x123   : > { %v630_v24 = vpop.f32.mrb[2].mxu1 }
 0x124   : > { %v631_v25 = vadd.f32 %v630_v24, %v526_v23  ;;  %v1560_v26 = vpop.f32.mrb[3].mxu1  ;;  %v2192_v24 = vld [vmem:[#allocation3 + $0x18] sm:$0xff] }
 0x126   : > { %1573 = vmatprep.subr.mxu0 %v631_v25 }
 0x127   : > { %1574 = vmatpush3.msra.mxu0 %v631_v25  ;;  %v2167_v6 = vpop.f32.mrb[4].mxu1 }
 0x128   : > { %v1563_v8 = vpop.f32.mrb[5].mxu1 }
 0x12b   : > { %v640_v9 = vpop.f32.mrb[6].mxu1 }
 0x12c   : > { %v1566_v10 = vpop.f32.mrb[7].mxu1 }
 0x12f   : > { %v645_v12 = vpop.f32.mrb[8].mxu1 }
 0x130   : > { %v1569_v13 = vpop.f32.mrb[9].mxu1 }
 0x133   : > { %v650_v14 = vpop.f32.mrb[10].mxu1 }
 0x134   : > { %v1572_v15 = vpop.f32.mrb[11].mxu1 }
 0x13c   : > { %1705 = vset.pattern.permute.xlu1 %v1870_v2  ;;  %v519_v2 = vld [vmem:[%s2387_s5 + $0x8] sm:$0xff] }
 0x19e   : > { %v459_v31 = vpop.trf.xlu1 }
 0x19f   : > { %476 = vst.msk [vmem:[#allocation2] sm:$0xff] %vm475_vm2, %v459_v31  ;;  %v2207_v31 = vld [vmem:[#allocation3 + $0x28] sm:$0xff] }
 0x1a2   : > { %v460_v32 = vpop.trf.xlu1 }
 0x1a3   : > { %477 = vst.msk [vmem:[#allocation2 + $0x8] sm:$0xff] %vm475_vm2, %v460_v32 }
 0x1a6   : > { %v461_v33 = vpop.trf.xlu1  ;;  %v654_v34 = vld [vmem:[#allocation2] sm:$0xff] }
 0x1a7   : > { %478 = vst.msk [vmem:[#allocation2 + $0x10] sm:$0xff] %vm475_vm2, %v461_v33  ;;  %1575 = vmatprep.mubr.msk.f32.mxu0 %vm475_vm2, %v654_v34 }
 0x1aa   : > { %v462_v35 = vpop.trf.xlu1  ;;  %v655_v36 = vld [vmem:[#allocation2 + $0x8] sm:$0xff] }
 0x1ab   : > { %479 = vst.msk [vmem:[#allocation2 + $0x18] sm:$0xff] %vm475_vm2, %v462_v35  ;;  %1576 = vmatmul.mubr.msk.f32.vlgmr.msra.gmra.mrb[0].mxu0 %vm475_vm2, %v655_v36  ;;  %v2217_v35 = vld [vmem:[#allocation3 + $0x20] sm:$0xff] }
 0x1ae   : > { %v463_v37 = vpop.trf.xlu1  ;;  %v656_v38 = vld [vmem:[#allocation2 + $0x10] sm:$0xff] }
 0x1af   : > { %480 = vst.msk [vmem:[#allocation2 + $0x20] sm:$0xff] %vm475_vm2, %v463_v37  ;;  %1578 = vmatprep.mubr.msk.f32.mxu0 %vm475_vm2, %v656_v38 }
 0x1b2   : > { %v464_v39 = vpop.trf.xlu1  ;;  %v657_v40 = vld [vmem:[#allocation2 + $0x18] sm:$0xff] }
 0x1b3   : > { %481 = vst.msk [vmem:[#allocation2 + $0x28] sm:$0xff] %vm475_vm2, %v464_v39  ;;  %1579 = vmatmul.mubr.msk.f32.gmra.mrb[2].mxu0 %vm475_vm2, %v657_v40  ;;  %v2232_v40 = vld [vmem:[#allocation3 + $0x30] sm:$0xff] }
 0x1b6   : > { %v465_v41 = vpop.trf.xlu1  ;;  %v658_v42 = vld [vmem:[#allocation2 + $0x20] sm:$0xff] }
 0x1b7   : > { %482 = vst.msk [vmem:[#allocation2 + $0x30] sm:$0xff] %vm475_vm2, %v465_v41  ;;  %1581 = vmatprep.mubr.msk.f32.mxu0 %vm475_vm2, %v658_v42 }
 0x1ba   : > { %v466_v43 = vpop.trf.xlu1  ;;  %v659_v44 = vld [vmem:[#allocation2 + $0x28] sm:$0xff] }
 0x1bb   : > { %483 = vst.msk [vmem:[#allocation2 + $0x38] sm:$0xff] %vm475_vm2, %v466_v43  ;;  %1582 = vmatmul.mubr.msk.f32.gmra.mrb[4].mxu0 %vm475_vm2, %v659_v44  ;;  %v2237_v43 = vld [vmem:[#allocation3 + $0x38] sm:$0xff] }
 0x1be   : > { %v660_v45 = vld [vmem:[#allocation2 + $0x30] sm:$0xff] }
 0x1bf   : > { %1584 = vmatprep.mubr.msk.f32.mxu0 %vm475_vm2, %v660_v45 }
 0x1c2   : > { %v661_v46 = vld [vmem:[#allocation2 + $0x38] sm:$0xff] }
 0x1c3   : > { %1585 = vmatmul.mubr.msk.f32.gmra.mrb[6].mxu0 %vm475_vm2, %v661_v46 }
 0x27e   : > { %v2126_v48 = vpop.f32.mrb[0].mxu0 }
 0x27f   : > { %v2128_v49 = vpop.f32.mrb[1].mxu0  ;;  %v804_v50 = vsel %vm800_vm4, %v2126_v48, -inf }
 0x280   : > { %805 = vmax.xlane.f32.xlu0 %v804_v50  ;;  %v801_v51 = vsel %vm800_vm4, %v2128_v49, -inf }
 0x281   : > { %802 = vmax.xlane.f32.xlu1 %v801_v51 }
 0x286   : > { %v2134_v52 = vpop.f32.mrb[2].mxu0 }
 0x287   : > { %v2136_v53 = vpop.f32.mrb[3].mxu0  ;;  %v810_v54 = vsel %vm800_vm4, %v2134_v52, -inf }
 0x288   : > { %811 = vmax.xlane.f32.xlu0 %v810_v54  ;;  %v807_v55 = vsel %vm800_vm4, %v2136_v53, -inf }
 0x28c   : > { %808 = vmax.xlane.f32.xlu0 %v807_v55 }
 0x28e   : > { %v2142_v56 = vpop.f32.mrb[4].mxu0 }
 0x28f   : > { %v2144_v57 = vpop.f32.mrb[5].mxu0  ;;  %v816_v58 = vsel %vm800_vm4, %v2142_v56, -inf }
 0x290   : > { %817 = vmax.xlane.f32.xlu0 %v816_v58  ;;  %v813_v60 = vsel %vm800_vm4, %v2144_v57, -inf }
 0x292   : > { %535 = vperm.xlu1 %1705, %v520_v59  }
 0x294   : > { %814 = vmax.xlane.f32.xlu0 %v813_v60 }
 0x296   : > { %v2156_v62 = vpop.f32.mrb[6].mxu0  ;;  %545 = vperm.xlu1 %1705, %v522_v61  }
 0x297   : > { %v2158_v63 = vpop.f32.mrb[7].mxu0  ;;  %v822_v1 = vsel %vm800_vm4, %v2156_v62, -inf }
 0x298   : > { %v819_v0 = vsel %vm800_vm4, %v2158_v63, -inf }
 0x299   : > { %820 = vmax.xlane.f32.xlu0 %v819_v0 }
 0x29d   : > { %823 = vmax.xlane.f32.xlu0 %v822_v1 }
 0x2b3   : > { %530 = vperm.xlu0 %1704, %v519_v2  }
 0x2b7   : > { %540 = vperm.xlu0 %1704, %v521_v11  }
 0x30d   : > { %v806_v18 = vpop.xlane.xlu0 %805 }
 0x30e   : > { %v2177_v19 = vmax.f32 %v2172_v16, %v806_v18  ;;  %v803_v20 = vpop.xlane.xlu1 %802 }
 0x30f   : > { %v2180_v21 = vmax.f32 %v2174_v17, %v803_v20 }
 0x310   : > { %v834_v22 = vsub.f32 %v2172_v16, %v2177_v19  ;;  %1192 = vst.msk [vmem:[#allocation3 + $0x8] sm:$0xff] %vm484_vm3, %v2177_v19  ;;  %864 = vperm.xlu1 %1705, %v2177_v19  }
 0x311   : > { %v833_v23 = vsub.f32 %v2174_v17, %v2180_v21  ;;  %1191 = vst.msk [vmem:[#allocation3] sm:$0xff] %vm484_vm3, %v2180_v21  ;;  %859 = vperm.xlu0 %1704, %v2180_v21  }
 0x312   : > { %v536_v47 = vpop.permute.xlu1 %535 }
 0x313   : > { %v641_v51 = vadd.f32 %v640_v9, %v536_v47 }
 0x315   : > { %v812_v25 = vpop.xlane.xlu0 %811 }
 0x316   : > { %v2195_v26 = vmax.f32 %v2192_v24, %v812_v25  ;;  %v546_v55 = vpop.permute.xlu1 %545 }
 0x317   : > { %v651_v60 = vadd.f32 %v650_v14, %v546_v55 }
 0x318   : > { %v836_v28 = vsub.f32 %v2192_v24, %v2195_v26  ;;  %1194 = vst.msk [vmem:[#allocation3 + $0x18] sm:$0xff] %vm484_vm3, %v2195_v26  ;;  %874 = vperm.xlu1 %1705, %v2195_v26  }
 0x319   : > { %v809_v29 = vpop.xlane.xlu0 %808 }
 0x31a   : > { %v2205_v30 = vmax.f32 %v2197_v27, %v809_v29 }
 0x31c   : > { %v835_v32 = vsub.f32 %v2197_v27, %v2205_v30  ;;  %1193 = vst.msk [vmem:[#allocation3 + $0x10] sm:$0xff] %vm484_vm3, %v2205_v30  ;;  %869 = vperm.xlu0 %1704, %v2205_v30  }
 0x31d   : > { %v818_v33 = vpop.xlane.xlu0 %817 }
 0x31e   : > { %v2215_v34 = vmax.f32 %v2207_v31, %v818_v33 }
 0x320   : > { %v838_v36 = vsub.f32 %v2207_v31, %v2215_v34  ;;  %1196 = vst.msk [vmem:[#allocation3 + $0x28] sm:$0xff] %vm484_vm3, %v2215_v34  ;;  %884 = vperm.xlu1 %1705, %v2215_v34   ;;  %v922_v31 = vld [vmem:[#allocation4 + $0x8] sm:$0xff] }
 0x321   : > { %v815_v37 = vpop.xlane.xlu0 %814 }
 0x322   : > { %v2225_v38 = vmax.f32 %v2217_v35, %v815_v37  ;;  %v851_v17 = vmul.f32 1.442695, %v838_v36 }
 0x324   : > { %v837_v39 = vsub.f32 %v2217_v35, %v2225_v38  ;;  %1195 = vst.msk [vmem:[#allocation3 + $0x20] sm:$0xff] %vm484_vm3, %v2225_v38  ;;  %879 = vperm.xlu0 %1704, %v2225_v38  }
 0x326   : > { %v821_v41 = vpop.xlane.xlu0 %820 }
 0x327   : > { %v2235_v42 = vmax.f32 %v2232_v40, %v821_v41 }
 0x329   : > { %v839_v44 = vsub.f32 %v2232_v40, %v2235_v42  ;;  %1197 = vst.msk [vmem:[#allocation3 + $0x30] sm:$0xff] %vm484_vm3, %v2235_v42  ;;  %889 = vperm.xlu0 %1704, %v2235_v42   ;;  %v924_v42 = vld [vmem:[#allocation4 + $0x18] sm:$0xff] }
 0x32a   : > { %v824_v45 = vpop.xlane.xlu0 %823 }
 0x32b   : > { %v2245_v46 = vmax.f32 %v2237_v43, %v824_v45  ;;  %v853_v16 = vmul.f32 1.442695, %v839_v44 }
 0x32d   : > { %v840_v50 = vsub.f32 %v2237_v43, %v2245_v46  ;;  %1198 = vst.msk [vmem:[#allocation3 + $0x38] sm:$0xff] %vm484_vm3, %v2245_v46  ;;  %894 = vperm.xlu1 %1705, %v2245_v46   ;;  %v923_v46 = vld [vmem:[#allocation4 + $0x10] sm:$0xff] }
 0x32f   : > { %v855_v19 = vmul.f32 1.442695, %v840_v50 }
 0x332   : > { %v531_v54 = vpop.permute.xlu0 %530 }
 0x333   : > { %v636_v58 = vadd.f32 %v2167_v6, %v531_v54 }
 0x335   : > { %v1619_v59 = vpack.c.bf16 %v641_v51, %v636_v58 }
 0x336   : > { %v541_v61 = vpop.permute.xlu0 %540 }
 0x337   : > { %v646_v0 = vadd.f32 %v645_v12, %v541_v61  ;;  %1621 = vmatprep.subr.msk.bf16.mxu0 %vm1620_vm5, %v1619_v59 }
 0x338   : > { %1624 = vmatpush3.bf16.xpose.msk.msra.mxu0 %vm1620_vm5, %v1619_v59 }
 0x339   : > { %v1625_v1 = vpack.c.bf16 %v651_v60, %v646_v0 }
 0x33b   : > { %1627 = vmatprep.subr.msk.bf16.mxu0 %vm1620_vm5, %v1625_v1 }
 0x340   : > { %1630 = vmatpush3.bf16.xpose.msk.msra.mxu0 %vm1620_vm5, %v1625_v1 }
 0x38f   : > { %v865_v2 = vpop.permute.xlu1 %864 }
 0x390   : > { %v898_v8 = vsub.f32 %v2126_v48, %v865_v2  ;;  %v860_v9 = vpop.permute.xlu0 %859 }
 0x391   : > { %v897_v10 = vsub.f32 %v2128_v49, %v860_v9 }
 0x392   : > { %v907_v11 = vmul.f32 1.442695, %v898_v8 }
 0x393   : > { %v905_v6 = vmul.f32 1.442695, %v897_v10 }
 0x394   : > { %1706 = vpow2.f32 %v907_v11  ;;  %v843_v11 = vmul.f32 1.442695, %v834_v22 }
 0x395   : > { %1708 = vpow2.f32 %v905_v6  ;;  %v841_v6 = vmul.f32 1.442695, %v833_v23 }
 0x397   : > { %v875_v13 = vpop.permute.xlu1 %874 }
 0x398   : > { %v900_v14 = vsub.f32 %v2134_v52, %v875_v13  ;;  %v845_v13 = vmul.f32 1.442695, %v835_v32  ;;  %v921_v32 = vld [vmem:[#allocation4] sm:$0xff] }
 0x39a   : > { %v911_v15 = vmul.f32 1.442695, %v900_v14  ;;  %v849_v14 = vmul.f32 1.442695, %v837_v39 }
 0x39b   : > { %v870_v12 = vpop.permute.xlu0 %869 }
 0x39c   : > { %1710 = vpow2.f32 %v911_v15  ;;  %v899_v18 = vsub.f32 %v2136_v53, %v870_v12  ;;  %v847_v15 = vmul.f32 1.442695, %v836_v28 }
 0x39e   : > { %v1707_v20 = vpop.eup %1706  ;;  %v909_v25 = vmul.f32 1.442695, %v899_v18 }
 0x39f   : > { %v1709_v29 = vpop.eup %1708  ;;  %v885_v33 = vpop.permute.xlu1 %884  ;;  %v940_v48 = vsel %vm800_vm4, %v1707_v20, 0.0 }
 0x3a0   : > { %1712 = vpow2.f32 %v909_v25  ;;  %v902_v49 = vsub.f32 %v2142_v56, %v885_v33  ;;  %941 = vadd.xlane.f32.xlu1 %v940_v48  ;;  %1595 = vmatprep.mubr.msk.f32.mxu0 %vm800_vm4, %v1709_v29  ;;  %v937_v37 = vsel %vm800_vm4, %v1709_v29, 0.0  ;;  %v926_v25 = vld [vmem:[#allocation4 + $0x28] sm:$0xff] }
 0x3a1   : > { %938 = vadd.xlane.f32.xlu0 %v937_v37  ;;  %1596 = vmatmul.mubr.msk.f32.vlgmr.msra.gmra.mrb[8].mxu0 %vm800_vm4, %v1707_v20  ;;  %v925_v37 = vld [vmem:[#allocation4 + $0x20] sm:$0xff] }
 0x3a2   : > { %v915_v52 = vmul.f32 1.442695, %v902_v49 }
 0x3a3   : > { %v880_v41 = vpop.permute.xlu0 %879 }
 0x3a4   : > { %1714 = vpow2.f32 %v915_v52  ;;  %v901_v53 = vsub.f32 %v2144_v57, %v880_v41 }
 0x3a6   : > { %v1711_v45 = vpop.eup %1710  ;;  %v913_v47 = vmul.f32 1.442695, %v901_v53 }
 0x3a7   : > { %v946_v51 = vsel %vm800_vm4, %v1711_v45, 0.0 }
 0x3a8   : > { %1716 = vpow2.f32 %v913_v47  ;;  %947 = vadd.xlane.f32.xlu0 %v946_v51  ;;  %v890_v56 = vpop.permute.xlu0 %889  ;;  %v927_v51 = vld [vmem:[#allocation4 + $0x30] sm:$0xff] }
 0x3a9   : > { %v903_v54 = vsub.f32 %v2158_v63, %v890_v56 }
 0x3aa   : > { %v1713_v55 = vpop.eup %1712 }
 0x3ab   : > { %v917_v58 = vmul.f32 1.442695, %v903_v54  ;;  %1598 = vmatprep.mubr.msk.f32.mxu0 %vm800_vm4, %v1713_v55  ;;  %v943_v59 = vsel %vm800_vm4, %v1713_v55, 0.0 }
 0x3ac   : > { %v895_v60 = vpop.permute.xlu1 %894  ;;  %944 = vadd.xlane.f32.xlu0 %v943_v59  ;;  %1599 = vmatmul.mubr.msk.f32.gmra.mrb[10].mxu0 %vm800_vm4, %v1711_v45  ;;  %v928_v59 = vld [vmem:[#allocation4 + $0x38] sm:$0xff] }
 0x3ad   : > { %1718 = vpow2.f32 %v917_v58  ;;  %v904_v57 = vsub.f32 %v2156_v62, %v895_v60 }
 0x3ae   : > { %v1715_v61 = vpop.eup %1714 }
 0x3af   : > { %v919_v0 = vmul.f32 1.442695, %v904_v57  ;;  %v952_v1 = vsel %vm800_vm4, %v1715_v61, 0.0 }
 0x3b0   : > { %953 = vadd.xlane.f32.xlu1 %v952_v1 }
 0x3b1   : > { %1720 = vpow2.f32 %v919_v0 }
 0x3b2   : > { %v1717_v63 = vpop.eup %1716  ;;  %1722 = vpow2.f32 %v843_v11 }
 0x3b3   : > { %1601 = vmatprep.mubr.msk.f32.mxu0 %vm800_vm4, %v1717_v63  ;;  %v949_v2 = vsel %vm800_vm4, %v1717_v63, 0.0  ;;  %1724 = vpow2.f32 %v841_v6 }
 0x3b4   : > { %950 = vadd.xlane.f32.xlu0 %v949_v2  ;;  %1602 = vmatmul.mubr.msk.f32.gmra.mrb[12].mxu0 %vm800_vm4, %v1715_v61  ;;  %1726 = vpow2.f32 %v845_v13 }
 0x3b5   : > { %1728 = vpow2.f32 %v849_v14 }
 0x3b6   : > { %1730 = vpow2.f32 %v847_v15 }
 0x3b7   : > { %v1719_v8 = vpop.eup %1718  ;;  %1732 = vpow2.f32 %v853_v16  ;;  %v1120_v16 = vld [vmem:[#allocation5 + $0x8] sm:$0xff] }
 0x3b8   : > { %1604 = vmatprep.mubr.msk.f32.mxu0 %vm800_vm4, %v1719_v8  ;;  %v955_v9 = vsel %vm800_vm4, %v1719_v8, 0.0  ;;  %1734 = vpow2.f32 %v851_v17  ;;  %v1119_v17 = vld [vmem:[#allocation5] sm:$0xff] }
 0x3b9   : > { %956 = vadd.xlane.f32.xlu0 %v955_v9  ;;  %1736 = vpow2.f32 %v855_v19 }
 0x3bb   : > { %v1721_v62 = vpop.eup %1720 }
 0x3bc   : > { %1605 = vmatmul.mubr.msk.f32.gmra.mrb[14].mxu0 %vm800_vm4, %v1721_v62  ;;  %v958_v10 = vsel %vm800_vm4, %v1721_v62, 0.0  ;;  %v1723_v21 = vpop.eup %1722 }
 0x3bd   : > { %959 = vadd.xlane.f32.xlu1 %v958_v10  ;;  %v1725_v22 = vpop.eup %1724  ;;  %v930_v34 = vmul.f32 %v1723_v21, %v922_v31 }
 0x3be   : > { %v1727_v23 = vpop.eup %1726  ;;  %v929_v36 = vmul.f32 %v1725_v22, %v921_v32  ;;  %v1121_v32 = vld [vmem:[#allocation5 + $0x10] sm:$0xff] }
 0x3bf   : > { %v1729_v24 = vpop.eup %1728  ;;  %v931_v12 = vmul.f32 %v1727_v23, %v923_v46  ;;  %v1123_v46 = vld [vmem:[#allocation5 + $0x20] sm:$0xff] }
 0x3c0   : > { %v1731_v26 = vpop.eup %1730  ;;  %v933_v53 = vmul.f32 %v1729_v24, %v925_v37  ;;  %v1125_v37 = vld [vmem:[#allocation5 + $0x30] sm:$0xff] }
 0x3c1   : > { %v1733_v27 = vpop.eup %1732  ;;  %v932_v43 = vmul.f32 %v1731_v26, %v924_v42 }
 0x3c2   : > { %v1735_v28 = vpop.eup %1734  ;;  %v935_v55 = vmul.f32 %v1733_v27, %v927_v51 }
 0x3c3   : > { %v1737_v30 = vpop.eup %1736  ;;  %v934_v48 = vmul.f32 %v1735_v28, %v926_v25 }
 0x3c4   : > { %v936_v0 = vmul.f32 %v1737_v30, %v928_v59 }
 0x3ce   : > { %1134 = vperm.xlu1 %1705, %v1723_v21  }
 0x3cf   : > { %1129 = vperm.xlu0 %1704, %v1725_v22  }
 0x3d2   : > { %1139 = vperm.xlu1 %1705, %v1727_v23  }
 0x3d3   : > { %1149 = vperm.xlu0 %1704, %v1729_v24  }
 0x3d6   : > { %1144 = vperm.xlu1 %1705, %v1731_v26  }
 0x3d7   : > { %1159 = vperm.xlu0 %1704, %v1733_v27  }
 0x3da   : > { %1154 = vperm.xlu1 %1705, %v1735_v28  }
 0x3db   : > { %1164 = vperm.xlu0 %1704, %v1737_v30   ;;  %v1122_v30 = vld [vmem:[#allocation5 + $0x18] sm:$0xff] }
 0x42d   : > { %v942_v35 = vpop.xlane.xlu1 %941 }
 0x42e   : > { %v962_v38 = vadd.f32 %v942_v35, %v930_v34  ;;  %v939_v39 = vpop.xlane.xlu0 %938 }
 0x42f   : > { %v961_v40 = vadd.f32 %v939_v39, %v929_v36 }
 0x430   : > { %971 = vst.msk [vmem:[#allocation4 + $0x8] sm:$0xff] %vm484_vm3, %v962_v38 }
 0x431   : > { %970 = vst.msk [vmem:[#allocation4] sm:$0xff] %vm484_vm3, %v961_v40 }
 0x435   : > { %v948_v44 = vpop.xlane.xlu0 %947 }
 0x436   : > { %v964_v50 = vadd.f32 %v948_v44, %v932_v43  ;;  %v1124_v43 = vld [vmem:[#allocation5 + $0x28] sm:$0xff] }
 0x437   : > { %v1203_v33 = vld [vmem:[#allocation4 + $0x8] sm:$0xff] }
 0x438   : > { %973 = vst.msk [vmem:[#allocation4 + $0x18] sm:$0xff] %vm484_vm3, %v964_v50  ;;  %v1202_v18 = vld [vmem:[#allocation4] sm:$0xff] }
 0x439   : > { %v945_v20 = vpop.xlane.xlu0 %944  ;;  %1738 = vrcp.f32 %v1202_v18 }
 0x43a   : > { %v963_v29 = vadd.f32 %v945_v20, %v931_v12  ;;  %1740 = vrcp.f32 %v1203_v33 }
 0x43c   : > { %972 = vst.msk [vmem:[#allocation4 + $0x10] sm:$0xff] %vm484_vm3, %v963_v29 }
 0x43d   : > { %v954_v49 = vpop.xlane.xlu1 %953 }
 0x43e   : > { %v966_v52 = vadd.f32 %v954_v49, %v934_v48  ;;  %v1126_v48 = vld [vmem:[#allocation5 + $0x38] sm:$0xff] }
 0x43f   : > { %v1205_v41 = vld [vmem:[#allocation4 + $0x18] sm:$0xff] }
 0x440   : > { %975 = vst.msk [vmem:[#allocation4 + $0x28] sm:$0xff] %vm484_vm3, %v966_v52  ;;  %1742 = vrcp.f32 %v1205_v41 }
 0x441   : > { %v951_v45 = vpop.xlane.xlu0 %950 }
 0x442   : > { %v965_v47 = vadd.f32 %v951_v45, %v933_v53 }
 0x443   : > { %v1739_v56 = vpop.eup %1738  ;;  %v1204_v54 = vld [vmem:[#allocation4 + $0x10] sm:$0xff] }
 0x444   : > { %974 = vst.msk [vmem:[#allocation4 + $0x20] sm:$0xff] %vm484_vm3, %v965_v47  ;;  %1236 = vperm.xlu1 %1705, %v1739_v56   ;;  %1744 = vrcp.f32 %v1204_v54  ;;  %v1741_v60 = vpop.eup %1740 }
 0x446   : > { %v957_v58 = vpop.xlane.xlu0 %956 }
 0x447   : > { %v967_v57 = vadd.f32 %v957_v58, %v935_v55  ;;  %v1207_v61 = vld [vmem:[#allocation4 + $0x28] sm:$0xff] }
 0x448   : > { %1241 = vperm.xlu1 %1705, %v1741_v60   ;;  %1746 = vrcp.f32 %v1207_v61 }
 0x449   : > { %976 = vst.msk [vmem:[#allocation4 + $0x30] sm:$0xff] %vm484_vm3, %v967_v57 }
 0x44a   : > { %v1743_v1 = vpop.eup %1742  ;;  %v960_v63 = vpop.xlane.xlu1 %959 }
 0x44b   : > { %v968_v2 = vadd.f32 %v960_v63, %v936_v0  ;;  %v1206_v8 = vld [vmem:[#allocation4 + $0x20] sm:$0xff] }
 0x44c   : > { %1251 = vperm.xlu1 %1705, %v1743_v1   ;;  %1748 = vrcp.f32 %v1206_v8 }
 0x44d   : > { %977 = vst.msk [vmem:[#allocation4 + $0x38] sm:$0xff] %vm484_vm3, %v968_v2 }
 0x44e   : > { %v1745_v9 = vpop.eup %1744  ;;  %v1135_v15 = vpop.permute.xlu1 %1134 }
 0x44f   : > { %1246 = vperm.xlu0 %1704, %v1745_v9   ;;  %v1130_v19 = vpop.permute.xlu0 %1129  ;;  %v1168_v21 = vmul.f32 %v1135_v15, %v1120_v16 }
 0x450   : > { %v1208_v62 = vld [vmem:[#allocation4 + $0x30] sm:$0xff]  ;;  %v1167_v22 = vmul.f32 %v1130_v19, %v1119_v17 }
 0x451   : > { %1750 = vrcp.f32 %v1208_v62 }
 0x452   : > { %v1747_v10 = vpop.eup %1746  ;;  %v1140_v24 = vpop.permute.xlu1 %1139 }
 0x453   : > { %1261 = vperm.xlu1 %1705, %v1747_v10   ;;  %v1169_v35 = vmul.f32 %v1140_v24, %v1121_v32  ;;  %v1150_v36 = vpop.permute.xlu0 %1149 }
 0x454   : > { %v1209_v11 = vld [vmem:[#allocation4 + $0x38] sm:$0xff]  ;;  %v1171_v18 = vmul.f32 %v1150_v36, %v1123_v46 }
 0x455   : > { %1752 = vrcp.f32 %v1209_v11 }
 0x456   : > { %v1749_v6 = vpop.eup %1748  ;;  %v1145_v31 = vpop.permute.xlu1 %1144 }
 0x457   : > { %1256 = vperm.xlu0 %1704, %v1749_v6   ;;  %v1170_v34 = vmul.f32 %v1145_v31, %v1122_v30  ;;  %v1160_v50 = vpop.permute.xlu0 %1159 }
 0x458   : > { %v1173_v41 = vmul.f32 %v1160_v50, %v1125_v37 }
 0x45a   : > { %v1155_v44 = vpop.permute.xlu1 %1154 }
 0x45b   : > { %v1751_v13 = vpop.eup %1750  ;;  %v1172_v12 = vmul.f32 %v1155_v44, %v1124_v43  ;;  %v1165_v49 = vpop.permute.xlu0 %1164 }
 0x45c   : > { %1266 = vperm.xlu0 %1704, %v1751_v13   ;;  %v1174_v52 = vmul.f32 %v1165_v49, %v1126_v48 }
 0x45f   : > { %v1753_v14 = vpop.eup %1752 }
 0x460   : > { %1271 = vperm.xlu1 %1705, %v1753_v14  }
 0x474   : > { %v1597_v23 = vpop.f32.mrb[8].mxu0 }
 0x475   : > { %v1176_v26 = vadd.f32 %v1597_v23, %v1168_v21  ;;  %v1080_v27 = vpop.f32.mrb[9].mxu0  ;;  %v1315_v21 = vstv %s1314_s17 }
 0x476   : > { %v1175_v28 = vadd.f32 %v1167_v22, %v1080_v27 }
 0x477   : > { %1184 = vst.msk [vmem:[#allocation5 + $0x8] sm:$0xff] %vm369_vm1, %v1176_v26 }
 0x478   : > { %1183 = vst.msk [vmem:[#allocation5] sm:$0xff] %vm369_vm1, %v1175_v28 }
 0x47e   : > { %v1227_v59 = vld [vmem:[#allocation5 + $0x8] sm:$0xff] }
 0x47f   : > { %v1600_v38 = vpop.f32.mrb[10].mxu0  ;;  %v1226_v54 = vld [vmem:[#allocation5] sm:$0xff] }
 0x480   : > { %v1178_v39 = vadd.f32 %v1600_v38, %v1170_v34  ;;  %v1090_v40 = vpop.f32.mrb[11].mxu0 }
 0x481   : > { %v1177_v42 = vadd.f32 %v1169_v35, %v1090_v40 }
 0x482   : > { %1186 = vst.msk [vmem:[#allocation5 + $0x18] sm:$0xff] %vm369_vm1, %v1178_v39 }
 0x483   : > { %1185 = vst.msk [vmem:[#allocation5 + $0x10] sm:$0xff] %vm369_vm1, %v1177_v42 }
 0x487   : > { %v1603_v20 = vpop.f32.mrb[12].mxu0 }
 0x488   : > { %v1180_v25 = vadd.f32 %v1603_v20, %v1172_v12  ;;  %v1100_v29 = vpop.f32.mrb[13].mxu0 }
 0x489   : > { %v1179_v33 = vadd.f32 %v1171_v18, %v1100_v29  ;;  %v1229_v63 = vld [vmem:[#allocation5 + $0x18] sm:$0xff] }
 0x48a   : > { %1188 = vst.msk [vmem:[#allocation5 + $0x28] sm:$0xff] %vm369_vm1, %v1180_v25  ;;  %v1228_v61 = vld [vmem:[#allocation5 + $0x10] sm:$0xff] }
 0x48b   : > { %1187 = vst.msk [vmem:[#allocation5 + $0x20] sm:$0xff] %vm369_vm1, %v1179_v33 }
 0x48f   : > { %v1606_v53 = vpop.f32.mrb[14].mxu0 }
 0x490   : > { %v1182_v45 = vadd.f32 %v1606_v53, %v1174_v52  ;;  %v1110_v47 = vpop.f32.mrb[15].mxu0 }
 0x491   : > { %v1181_v51 = vadd.f32 %v1173_v41, %v1110_v47  ;;  %v1231_v11 = vld [vmem:[#allocation5 + $0x28] sm:$0xff] }
 0x492   : > { %1190 = vst.msk [vmem:[#allocation5 + $0x38] sm:$0xff] %vm369_vm1, %v1182_v45  ;;  %v1230_v9 = vld [vmem:[#allocation5 + $0x20] sm:$0xff] }
 0x493   : > { %1189 = vst.msk [vmem:[#allocation5 + $0x30] sm:$0xff] %vm369_vm1, %v1181_v51 }
 0x499   : > { %v1233_v17 = vld [vmem:[#allocation5 + $0x38] sm:$0xff] }
 0x49a   : > { %v1232_v14 = vld [vmem:[#allocation5 + $0x30] sm:$0xff] }
 0x4c3   : > { %v1237_v56 = vpop.permute.xlu1 %1236 }
 0x4c4   : > { %v1274_v55 = vmul.f32 %v1237_v56, %v1226_v54 }
 0x4c6   : > { %1282 = vxpose.xlu0.b32.start [1/8] (short) (narrow) %v1274_v55, 32 }
 0x4c7   : > { %v1242_v58 = vpop.permute.xlu1 %1241 }
 0x4c8   : > { %v1275_v60 = vmul.f32 %v1242_v58, %v1227_v59 }
 0x4ca   : > { %1283 = vxpose.xlu0.b32.cont [2/8] (short) (narrow) %v1275_v60, 32 }
 0x4cb   : > { %v1252_v1 = vpop.permute.xlu1 %1251 }
 0x4cc   : > { %v1277_v2 = vmul.f32 %v1252_v1, %v1229_v63 }
 0x4ce   : > { %v1247_v57 = vpop.permute.xlu0 %1246 }
 0x4cf   : > { %v1276_v0 = vmul.f32 %v1247_v57, %v1228_v61 }
 0x4d1   : > { %1284 = vxpose.xlu0.b32.cont [3/8] (short) (narrow) %v1276_v0, 32 }
 0x4d2   : > { %v1262_v10 = vpop.permute.xlu1 %1261 }
 0x4d3   : > { %v1279_v6 = vmul.f32 %v1262_v10, %v1231_v11 }
 0x4d5   : > { %1285 = vxpose.xlu0.b32.cont [4/8] (short) (narrow) %v1277_v2, 32 }
 0x4d6   : > { %v1257_v8 = vpop.permute.xlu0 %1256 }
 0x4d7   : > { %v1278_v62 = vmul.f32 %v1257_v8, %v1230_v9 }
 0x4d9   : > { %1286 = vxpose.xlu0.b32.cont [5/8] (short) (narrow) %v1278_v62, 32 }
 0x4db   : > { %v1267_v13 = vpop.permute.xlu0 %1266 }
 0x4dc   : > { %v1280_v15 = vmul.f32 %v1267_v13, %v1232_v14 }
 0x4dd   : > { %1287 = vxpose.xlu0.b32.cont [6/8] (short) (narrow) %v1279_v6, 32 }
 0x4df   : > { %v1272_v16 = vpop.permute.xlu1 %1271 }
 0x4e0   : > { %v1281_v19 = vmul.f32 %v1272_v16, %v1233_v17 }
 0x4e1   : > { %1288 = vxpose.xlu0.b32.cont [7/8] (short) (narrow) %v1280_v15, 32 }
 0x4e5   : > { %1289 = vxpose.xlu0.b32.end [8/8] (short) (narrow) %v1281_v19, 32 }
 0x549   : > { %v1298_v22 = vpop.trf.xlu0 }
 0x54a   : > { %v1316_v23 = vmul.f32 %v1315_v21, %v1298_v22 }
 0x54c   : > { %v1324_v24 = vadd.f32 %v1316_v23, %v2034_v3 }
 0x54d   : > { %v1299_v26 = vpop.trf.xlu0 }
 0x54e   : > { %1328 = vst.msk [vmem:[%s337_s22] sm:$0xff] %vm800_vm4, %v1324_v24  ;;  %v1317_v27 = vmul.f32 %v1315_v21, %v1299_v26 }
 0x550   : > { %v1325_v28 = vadd.f32 %v1317_v27, %v2036_v4 }
 0x551   : > { %v1300_v30 = vpop.trf.xlu0 }
 0x552   : > { %1329 = vst.msk [vmem:[%s337_s22 + $0x8] sm:$0xff] %vm800_vm4, %v1325_v28  ;;  %v1318_v31 = vmul.f32 %v1315_v21, %v1300_v30 }
 0x554   : > { %v1326_v32 = vadd.f32 %v1318_v31, %v2038_v5 }
 0x555   : > { %v1301_v34 = vpop.trf.xlu0 }
 0x556   : > { %1330 = vst.msk [vmem:[%s337_s22 + $0x10] sm:$0xff] %vm800_vm4, %v1326_v32  ;;  %v1319_v3 = vmul.f32 %v1315_v21, %v1301_v34 }
 0x558   : > { %v1327_v4 = vadd.f32 %v1319_v3, %v2042_v7 }
 0x55a   : > { %1331 = vst.msk [vmem:[%s337_s22 + $0x18] sm:$0xff] %vm800_vm4, %v1327_v4 }
 0x55b   : > { %1795 = shalt.err (!%p1792_p6)
}
 0x55c   : > { %s1796_s16 = scalar_lea.hbm %s2332_s9, 512  ;;  %s1800_s21 = scalar_lea.hbm %s2389_s7, 1024 }
 0x55d   : > { %p1797_p7 = scmp.ne.s32.totalorder %s2332_s9, %s1796_s16  ;;  %p1801_p0 = scmp.lt.u32.totalorder %s2332_s9, %s2389_s7 }
 0x55e   : > { %p1802_p2 = scmp.lt.u32.totalorder %s1800_s21, %s1796_s16  ;;  %p1804_p8 = scmp.lt.u32.totalorder %s1796_s16, %s2332_s9 }
 0x55f   : > { %p1798_p9 = pnand %p1797_p7, %p2401_p10 }
 0x560   : > { %p1803_p4 = por %p1802_p2, %p1801_p0 }
 0x561   : > { %p1799_p12 = pneg %p1798_p9 }
 0x562   : > { %p1805_p11 = por %p1804_p8, %p1803_p4 }
 0x564   : > { %p1806_p13 = pnand %p1805_p11, %p1799_p12 }
 0x566   : > { %1809 = shalt.err (!%p1806_p13)
}
 0x567   : > { %s1873_s25 = smov 128   ;;  %s1874_s6 = smov 8  }
 0x568   : > { %1635 = dma.vmem_to_hbm [thread:$0]  (%p2401_p10), %s2327_s23, 512, %s2332_s9, %s2336_s11, %s1873_s25, %s1873_s25, %s1874_s6  }
 0x569 PF: > { %p1647_p1 = scmp.ge.s32.totalorder %s1864_s8, 2  ;;  %s1362_s29 = sand.u32 1, %s1844_s26  }
 0x56a   : > { %p2402_p3 = scmp.ne.s32.totalorder %s2395_s14, 0  ;;  %s1363_s13 = scalar_lea.sflag [#allocation9], %s1362_s29 }
 0x56c   : > { %p1642_p5 = pnand %p1647_p1, %p2402_p3 }
 0x56e   : > { %1839 = dma.done.wait (!%p1642_p5), %s1363_s13, 512  }
 0x56f   : > { %1841 = vsyncadd (!%p1642_p5), %s1363_s13, 4294966784  ;;  %s22_s8 = sadd.s32 1, %s1864_s8   ;;  %s2403_s26 = smov %s1848_s27 }
 0x570   : > { %p19_p6 = scmp.ge.s32.totalorder %s22_s8, 4   ;;  %s2404_s27 = smov %s1852_s28 }
 0x571   : > { %s2405_s28 = smov %s1971_s15  ;;  %s2406_s29 = smov %s1860_s30 }
 0x572   : > { %s2407_s30 = smov %s2409_s10  ;;  %21 = sbr.rel (!%p19_p6) target bundleno = 7 (0x7), region = 99 }
 0x579   :  { %1368 = vsyncpa [#allocation8], 1 }
 0x57a   :  { %1370 = vsyncpa [#allocation8 + $0x1], 1 }
 0x57b   :  { %1371 = vsyncpa [#allocation9], 1 }
 0x57c   :  { %1373 = vsyncpa [#allocation9 + $0x1], 1 }

</bundles_post_ra>
